<compile_context>
chip_gen: v5e
topology: v5e:2x2
jax: 0.10.0
libtpu: 0.0.40
codegen_flags: <defaults>
</compile_context>

<pallas_src>
import jax
import jax.numpy as jnp
import numpy as np
from jax import lax
from jax.experimental import pallas as pl
from jax.experimental.pallas import tpu as pltpu

# ----------------------------- model dims (small) ---------------------------
VOCAB_SIZE = 50
EMBEDDING_DIM = 32
HIDDEN_DIM = 32
NUM_LAYERS = 2
BATCH = 2
SEQ = 8

LANE = 128   # TPU lane width; vocab dim padded up to a multiple of this
SUB = 8      # sublane tile

VP = max(LANE, ((VOCAB_SIZE + LANE - 1) // LANE) * LANE)   # padded vocab (128)

# ---- packed parameter slab layouts (row offsets, all at sublane multiples) --
# slab32: lane width = HIDDEN_DIM (== EMBEDDING_DIM)
OFF_EMB = 0                                   # (VP, E)   embedding, vocab-padded
OFF_WIH0 = OFF_EMB + VP                       # (E, H)    weight_ih_l0^T
OFF_WHH0 = OFF_WIH0 + EMBEDDING_DIM           # (H, H)    weight_hh_l0^T
OFF_WIH1 = OFF_WHH0 + HIDDEN_DIM              # (H, H)    weight_ih_l1^T
OFF_WHH1 = OFF_WIH1 + HIDDEN_DIM              # (H, H)    weight_hh_l1^T
OFF_B0 = OFF_WHH1 + HIDDEN_DIM                # row: b_ih_l0 + b_hh_l0
OFF_B1 = OFF_B0 + SUB                         # row: b_ih_l1 + b_hh_l1
ROWS32 = OFF_B1 + SUB
# slab128: lane width = VP
OFF_FCW = 0                                   # (H, VP)   fc.weight^T, padded
OFF_FCB = OFF_FCW + HIDDEN_DIM                # row: fc.bias, padded
ROWS128 = OFF_FCB + SUB


# --------------------------------- kernel -----------------------------------
def rnn_lm_kernel(
    ids_ref,      # (T*B, 1) int32 token ids, TIME-major rows (row = t*B + b)
    h_init_ref,   # (L, B, H)  f32 initial hidden state
    p32_ref,      # (ROWS32, H)  f32 packed slab: emb | Wih0 | Whh0 | Wih1 | Whh1 | b0 | b1
    p128_ref,     # (ROWS128, VP) f32 packed slab: fcW | fcb
    logits_ref,   # (T*B, VP)  f32 out, lane-dense, TIME-major rows (t*B + b)
    h_out_ref,    # (L, B, H)  f32 out (aliased with h_init)
    hs_sc,        # (T*B, H)   VMEM scratch: layer-1 outputs, time-major rows
):
    TB = ids_ref.shape[0]
    L, B, H = h_init_ref.shape
    T = TB // B
    E = EMBEDDING_DIM
    Vp = p128_ref.shape[1]

    # ---------- prologue: everything off the recurrent critical path ---------
    emb = p32_ref[OFF_EMB:OFF_EMB + Vp, :]            # (Vp, E)
    wih0 = p32_ref[OFF_WIH0:OFF_WIH0 + E, :]          # (E, H)
    whh0 = p32_ref[OFF_WHH0:OFF_WHH0 + H, :]          # (H, H)
    wih1 = p32_ref[OFF_WIH1:OFF_WIH1 + H, :]          # (H, H)
    whh1 = p32_ref[OFF_WHH1:OFF_WHH1 + H, :]          # (H, H)
    b0 = p32_ref[OFF_B0:OFF_B0 + 1, :]                # (1, H)
    b1 = p32_ref[OFF_B1:OFF_B1 + 1, :]                # (1, H)
    fcw = p128_ref[OFF_FCW:OFF_FCW + H, :]            # (H, Vp)
    fcb = p128_ref[OFF_FCB:OFF_FCB + 1, :]            # (1, Vp)

    # Embedding lookup as one-hot @ table (exact for int ids), plus the layer-0
    # input projection and bias, batched over ALL timesteps at once.
    onehot = (ids_ref[...] ==
              lax.broadcasted_iota(jnp.int32, (TB, Vp), 1)).astype(jnp.float32)
    x_emb = jnp.dot(onehot, emb, preferred_element_type=jnp.float32)   # (TB, E)
    x0_all = (jnp.dot(x_emb, wih0, preferred_element_type=jnp.float32)
              + b0)                                                    # (TB, H)

    b1b = jnp.broadcast_to(b1, (B, H))   # hoisted broadcast (no per-iter bcast)

    # Carries as SSA values — never round-tripped through VMEM inside the loop.
    h0 = h_init_ref[0]                   # (B, H)
    h1 = h_init_ref[1]                   # (B, H)

    # ---------- serial recurrence: 1 dependent K=32 matmul per step ----------
    # The two layer-1 matmuls per step depend only on (h0_t, h1_{t-1}) and hide
    # under the layer-0 chain; LLO scheduler interleaves them freely.
    for t in range(T):                   # static unroll (T is small)
        x0_t = x0_all[t * B:(t + 1) * B, :]                            # (B, H)
        h0 = jnp.tanh(
            x0_t + jnp.dot(h0, whh0, preferred_element_type=jnp.float32))
        h1 = jnp.tanh(
            jnp.dot(h0, wih1, preferred_element_type=jnp.float32)
            + jnp.dot(h1, whh1, preferred_element_type=jnp.float32)
            + b1b)
        # One contiguous (B, H) block store per step (time-major), off-chain.
        hs_sc[t * B:(t + 1) * B, :] = h1

    # ---------- epilogue: one fused FC head, lane-dense (T*B, Vp) output -----
    logits_ref[...] = (
        jnp.dot(hs_sc[...], fcw, preferred_element_type=jnp.float32) + fcb)
    h_out_ref[0] = h0
    h_out_ref[1] = h1


# ------------------------- one-time parameter packing ------------------------
def pack_params(params):
    """Pre-pack all weights into two VMEM slabs. Call ONCE (not per forward)."""
    emb = params["embedding"].astype(jnp.float32)          # (V, E)
    V, E = emb.shape
    H = params["weight_hh_l0"].shape[0]

    p32 = jnp.zeros((ROWS32, H), jnp.float32)
    p32 = p32.at[OFF_EMB:OFF_EMB + V, :E].set(emb)
    p32 = p32.at[OFF_WIH0:OFF_WIH0 + E, :].set(params["weight_ih_l0"].T)
    p32 = p32.at[OFF_WHH0:OFF_WHH0 + H, :].set(params["weight_hh_l0"].T)
    p32 = p32.at[OFF_WIH1:OFF_WIH1 + H, :].set(params["weight_ih_l1"].T)
    p32 = p32.at[OFF_WHH1:OFF_WHH1 + H, :].set(params["weight_hh_l1"].T)
    p32 = p32.at[OFF_B0, :].set(params["bias_ih_l0"] + params["bias_hh_l0"])
    p32 = p32.at[OFF_B1, :].set(params["bias_ih_l1"] + params["bias_hh_l1"])

    p128 = jnp.zeros((ROWS128, VP), jnp.float32)
    p128 = p128.at[OFF_FCW:OFF_FCW + H, :V].set(params["fc_weight"].T)
    p128 = p128.at[OFF_FCB, :V].set(params["fc_bias"])
    return p32, p128


# -------------------------------- wrapper ------------------------------------
@jax.jit
def rnn_language_model_forward(x, hidden, p32, p128):
    """x: (B, T) int32 token ids, hidden: (L, B, H) f32, p32/p128: packed slabs.

    Returns (logits (B*T, V), hidden (L, B, H)) matching the PyTorch module.
    """
    B, T = x.shape
    L, _, H = hidden.shape
    Vp = p128.shape[1]

    # Token ids, time-major rows (row = t*B + b). Tiny (T*B*4 bytes) layout op.
    ids_tm = jnp.transpose(x, (1, 0)).reshape(T * B, 1).astype(jnp.int32)

    vmem = pl.BlockSpec(memory_space=pltpu.MemorySpace.VMEM)

    logits_tm, h_out = pl.pallas_call(
        rnn_lm_kernel,
        out_shape=(
            jax.ShapeDtypeStruct((T * B, Vp), jnp.float32),
            jax.ShapeDtypeStruct((L, B, H), jnp.float32),
        ),
        in_specs=[vmem, vmem, vmem, vmem],
        out_specs=(vmem, vmem),
        scratch_shapes=[pltpu.VMEM((T * B, H), jnp.float32)],   # hs_sc
        input_output_aliases={1: 1},                            # hidden in->out
    )(ids_tm, hidden, p32, p128)

    # Time-major (t*B+b) -> PyTorch row order (b*T+t) and drop vocab padding:
    # an 8 KiB reshape/slice — noise next to the kernel.
    logits = logits_tm.reshape(T, B, Vp).transpose(1, 0, 2).reshape(B * T, Vp)
    return logits[:, :VOCAB_SIZE], h_out


# ------------------------- deterministic param init --------------------------
def init_params(key):
    ks = jax.random.split(key, 12)
    s_rnn = 1.0 / np.sqrt(HIDDEN_DIM)
    u = lambda k, shp, s: jax.random.uniform(k, shp, jnp.float32, -s, s)
    return {
        "embedding": jax.random.normal(ks[0], (VOCAB_SIZE, EMBEDDING_DIM),
                                       jnp.float32),
        "weight_ih_l0": u(ks[1], (HIDDEN_DIM, EMBEDDING_DIM), s_rnn),
        "weight_hh_l0": u(ks[2], (HIDDEN_DIM, HIDDEN_DIM), s_rnn),
        "bias_ih_l0": u(ks[3], (HIDDEN_DIM,), s_rnn),
        "bias_hh_l0": u(ks[4], (HIDDEN_DIM,), s_rnn),
        "weight_ih_l1": u(ks[5], (HIDDEN_DIM, HIDDEN_DIM), s_rnn),
        "weight_hh_l1": u(ks[6], (HIDDEN_DIM, HIDDEN_DIM), s_rnn),
        "bias_ih_l1": u(ks[7], (HIDDEN_DIM,), s_rnn),
        "bias_hh_l1": u(ks[8], (HIDDEN_DIM,), s_rnn),
        "fc_weight": u(ks[9], (VOCAB_SIZE, HIDDEN_DIM), 1.0 / np.sqrt(HIDDEN_DIM)),
        "fc_bias": u(ks[10], (VOCAB_SIZE,), 1.0 / np.sqrt(HIDDEN_DIM)),
    }


# ------------------------------ JAX reference --------------------------------
def reference_forward(x, hidden, p):
    emb = p["embedding"][x]                                   # (B, T, E)
    B, T, _ = emb.shape
    h0, h1 = hidden[0], hidden[1]
    outs = []
    for t in range(T):
        xt = emb[:, t, :]
        h0 = jnp.tanh(xt @ p["weight_ih_l0"].T + p["bias_ih_l0"]
                      + h0 @ p["weight_hh_l0"].T + p["bias_hh_l0"])
        h1 = jnp.tanh(h0 @ p["weight_ih_l1"].T + p["bias_ih_l1"]
                      + h1 @ p["weight_hh_l1"].T + p["bias_hh_l1"])
        outs.append(h1)
    out = jnp.stack(outs, axis=1).reshape(-1, HIDDEN_DIM)      # (B*T, H)
    logits = out @ p["fc_weight"].T + p["fc_bias"]             # (B*T, V)
    return logits, jnp.stack([h0, h1], axis=0)


# ---------------------------------- main --------------------------------------
if __name__ == "__main__":
    key = jax.random.PRNGKey(0)
    pkey, xkey = jax.random.split(key)
    params = init_params(pkey)

    # One-time parameter packing, hoisted out of the forward path.
    p32, p128 = pack_params(params)
    p32, p128 = jax.block_until_ready((p32, p128))

    x = jax.random.randint(xkey, (BATCH, SEQ), 0, VOCAB_SIZE, dtype=jnp.int32)
    hidden = jnp.zeros((NUM_LAYERS, BATCH, HIDDEN_DIM), jnp.float32)  # init_hidden

    logits, h_out = rnn_language_model_forward(x, hidden, p32, p128)
    jax.block_until_ready((logits, h_out))

    ref_logits, ref_h = reference_forward(x, hidden, params)
    np.testing.assert_allclose(np.asarray(logits), np.asarray(ref_logits),
                               rtol=1e-5, atol=1e-5)
    np.testing.assert_allclose(np.asarray(h_out), np.asarray(ref_h),
                               rtol=1e-5, atol=1e-5)

    assert logits.shape == (BATCH * SEQ, VOCAB_SIZE)
    assert h_out.shape == (NUM_LAYERS, BATCH, HIDDEN_DIM)
    print("KERNEL_OK")
</pallas_src>

<mosaic_0001>
module attributes {stable_mosaic.version = 11 : i64} {
  func.func @rnn_lm_kernel(%arg0: memref<16x1xi32, #tpu.memory_space<vmem>>, %arg1: memref<2x2x32xf32, #tpu.memory_space<vmem>>, %arg2: memref<272x32xf32, #tpu.memory_space<vmem>>, %arg3: memref<40x128xf32, #tpu.memory_space<vmem>>, %arg4: memref<16x128xf32, #tpu.memory_space<vmem>>, %arg5: memref<2x2x32xf32, #tpu.memory_space<vmem>>, %arg6: memref<16x32xf32, #tpu.memory_space<vmem>>) attributes {dimension_semantics = [], scalar_prefetch = 0 : i64, scratch_operands = 1 : i64, tpu.core_type = #tpu.core_type<tc>} {
    %c0 = arith.constant 0 : index
    %c0_0 = arith.constant 0 : index
    %0 = vector.load %arg2[%c0, %c0_0] : memref<272x32xf32, #tpu.memory_space<vmem>>, vector<128x32xf32>
    %c128 = arith.constant 128 : index
    %c0_1 = arith.constant 0 : index
    %1 = vector.load %arg2[%c128, %c0_1] : memref<272x32xf32, #tpu.memory_space<vmem>>, vector<32x32xf32>
    %c160 = arith.constant 160 : index
    %c0_2 = arith.constant 0 : index
    %2 = vector.load %arg2[%c160, %c0_2] : memref<272x32xf32, #tpu.memory_space<vmem>>, vector<32x32xf32>
    %c192 = arith.constant 192 : index
    %c0_3 = arith.constant 0 : index
    %3 = vector.load %arg2[%c192, %c0_3] : memref<272x32xf32, #tpu.memory_space<vmem>>, vector<32x32xf32>
    %c224 = arith.constant 224 : index
    %c0_4 = arith.constant 0 : index
    %4 = vector.load %arg2[%c224, %c0_4] : memref<272x32xf32, #tpu.memory_space<vmem>>, vector<32x32xf32>
    %c256 = arith.constant 256 : index
    %c0_5 = arith.constant 0 : index
    %5 = vector.load %arg2[%c256, %c0_5] : memref<272x32xf32, #tpu.memory_space<vmem>>, vector<1x32xf32>
    %c264 = arith.constant 264 : index
    %c0_6 = arith.constant 0 : index
    %6 = vector.load %arg2[%c264, %c0_6] : memref<272x32xf32, #tpu.memory_space<vmem>>, vector<1x32xf32>
    %c0_7 = arith.constant 0 : index
    %c0_8 = arith.constant 0 : index
    %7 = vector.load %arg3[%c0_7, %c0_8] : memref<40x128xf32, #tpu.memory_space<vmem>>, vector<32x128xf32>
    %c32 = arith.constant 32 : index
    %c0_9 = arith.constant 0 : index
    %8 = vector.load %arg3[%c32, %c0_9] : memref<40x128xf32, #tpu.memory_space<vmem>>, vector<1x128xf32>
    %c0_10 = arith.constant 0 : index
    %c0_11 = arith.constant 0 : index
    %9 = vector.load %arg0[%c0_10, %c0_11] : memref<16x1xi32, #tpu.memory_space<vmem>>, vector<16x1xi32>
    %10 = tpu.iota {dimensions = array<i32: 1>} : vector<16x128xi32>
    %11 = vector.broadcast %9 : vector<16x1xi32> to vector<16x128xi32>
    %12 = arith.cmpi eq, %11, %10 : vector<16x128xi32>
    %13 = arith.extui %12 : vector<16x128xi1> to vector<16x128xi32>
    %14 = arith.sitofp %13 : vector<16x128xi32> to vector<16x128xf32>
    %cst = arith.constant dense<0.000000e+00> : vector<16x32xf32>
    %15 = tpu.matmul %14, %0, %cst {dimension_numbers = #tpu.dot_dimension_numbers<[1], [0], [0], [1], [0, 0, 1, 1], [], []>} : vector<16x128xf32>, vector<128x32xf32>, vector<16x32xf32> -> vector<16x32xf32>
    %cst_12 = arith.constant dense<0.000000e+00> : vector<16x32xf32>
    %16 = tpu.matmul %15, %1, %cst_12 {dimension_numbers = #tpu.dot_dimension_numbers<[1], [0], [0], [1], [0, 0, 1, 1], [], []>} : vector<16x32xf32>, vector<32x32xf32>, vector<16x32xf32> -> vector<16x32xf32>
    %17 = vector.broadcast %5 : vector<1x32xf32> to vector<16x32xf32>
    %18 = arith.addf %16, %17 : vector<16x32xf32>
    %19 = vector.shape_cast %6 : vector<1x32xf32> to vector<1x32xf32>
    %20 = vector.broadcast %19 : vector<1x32xf32> to vector<2x32xf32>
    %c0_13 = arith.constant 0 : index
    %c0_14 = arith.constant 0 : index
    %c0_15 = arith.constant 0 : index
    %21 = vector.load %arg1[%c0_13, %c0_14, %c0_15] : memref<2x2x32xf32, #tpu.memory_space<vmem>>, vector<1x2x32xf32>
    %22 = vector.shape_cast %21 : vector<1x2x32xf32> to vector<2x32xf32>
    %c1 = arith.constant 1 : index
    %c0_16 = arith.constant 0 : index
    %c0_17 = arith.constant 0 : index
    %23 = vector.load %arg1[%c1, %c0_16, %c0_17] : memref<2x2x32xf32, #tpu.memory_space<vmem>>, vector<1x2x32xf32>
    %24 = vector.shape_cast %23 : vector<1x2x32xf32> to vector<2x32xf32>
    %25 = vector.extract_strided_slice %18 {offsets = [0, 0], sizes = [2, 32], strides = [1, 1]} : vector<16x32xf32> to vector<2x32xf32>
    %cst_18 = arith.constant dense<0.000000e+00> : vector<2x32xf32>
    %26 = tpu.matmul %22, %2, %cst_18 {dimension_numbers = #tpu.dot_dimension_numbers<[1], [0], [0], [1], [0, 0, 1, 1], [], []>} : vector<2x32xf32>, vector<32x32xf32>, vector<2x32xf32> -> vector<2x32xf32>
    %27 = arith.addf %25, %26 : vector<2x32xf32>
    %28 = math.tanh %27 : vector<2x32xf32>
    %cst_19 = arith.constant dense<0.000000e+00> : vector<2x32xf32>
    %29 = tpu.matmul %28, %3, %cst_19 {dimension_numbers = #tpu.dot_dimension_numbers<[1], [0], [0], [1], [0, 0, 1, 1], [], []>} : vector<2x32xf32>, vector<32x32xf32>, vector<2x32xf32> -> vector<2x32xf32>
    %cst_20 = arith.constant dense<0.000000e+00> : vector<2x32xf32>
    %30 = tpu.matmul %24, %4, %cst_20 {dimension_numbers = #tpu.dot_dimension_numbers<[1], [0], [0], [1], [0, 0, 1, 1], [], []>} : vector<2x32xf32>, vector<32x32xf32>, vector<2x32xf32> -> vector<2x32xf32>
    %31 = arith.addf %29, %30 : vector<2x32xf32>
    %32 = arith.addf %31, %20 : vector<2x32xf32>
    %33 = math.tanh %32 : vector<2x32xf32>
    %c0_21 = arith.constant 0 : index
    %c0_22 = arith.constant 0 : index
    %34 = vector.load %arg6[%c0_21, %c0_22] : memref<16x32xf32, #tpu.memory_space<vmem>>, vector<2x32xf32>
    tpu.vector_store %arg6[%c0_21, %c0_22], %33 {strides = array<i32>} : memref<16x32xf32, #tpu.memory_space<vmem>>, vector<2x32xf32>,
    %35 = vector.extract_strided_slice %18 {offsets = [2, 0], sizes = [2, 32], strides = [1, 1]} : vector<16x32xf32> to vector<2x32xf32>
    %cst_23 = arith.constant dense<0.000000e+00> : vector<2x32xf32>
    %36 = tpu.matmul %28, %2, %cst_23 {dimension_numbers = #tpu.dot_dimension_numbers<[1], [0], [0], [1], [0, 0, 1, 1], [], []>} : vector<2x32xf32>, vector<32x32xf32>, vector<2x32xf32> -> vector<2x32xf32>
    %37 = arith.addf %35, %36 : vector<2x32xf32>
    %38 = math.tanh %37 : vector<2x32xf32>
    %cst_24 = arith.constant dense<0.000000e+00> : vector<2x32xf32>
    %39 = tpu.matmul %38, %3, %cst_24 {dimension_numbers = #tpu.dot_dimension_numbers<[1], [0], [0], [1], [0, 0, 1, 1], [], []>} : vector<2x32xf32>, vector<32x32xf32>, vector<2x32xf32> -> vector<2x32xf32>
    %cst_25 = arith.constant dense<0.000000e+00> : vector<2x32xf32>
    %40 = tpu.matmul %33, %4, %cst_25 {dimension_numbers = #tpu.dot_dimension_numbers<[1], [0], [0], [1], [0, 0, 1, 1], [], []>} : vector<2x32xf32>, vector<32x32xf32>, vector<2x32xf32> -> vector<2x32xf32>
    %41 = arith.addf %39, %40 : vector<2x32xf32>
    %42 = arith.addf %41, %20 : vector<2x32xf32>
    %43 = math.tanh %42 : vector<2x32xf32>
    %c2 = arith.constant 2 : index
    %c0_26 = arith.constant 0 : index
    %44 = vector.load %arg6[%c2, %c0_26] : memref<16x32xf32, #tpu.memory_space<vmem>>, vector<2x32xf32>
    tpu.vector_store %arg6[%c2, %c0_26], %43 {strides = array<i32>} : memref<16x32xf32, #tpu.memory_space<vmem>>, vector<2x32xf32>,
    %45 = vector.extract_strided_slice %18 {offsets = [4, 0], sizes = [2, 32], strides = [1, 1]} : vector<16x32xf32> to vector<2x32xf32>
    %cst_27 = arith.constant dense<0.000000e+00> : vector<2x32xf32>
    %46 = tpu.matmul %38, %2, %cst_27 {dimension_numbers = #tpu.dot_dimension_numbers<[1], [0], [0], [1], [0, 0, 1, 1], [], []>} : vector<2x32xf32>, vector<32x32xf32>, vector<2x32xf32> -> vector<2x32xf32>
    %47 = arith.addf %45, %46 : vector<2x32xf32>
    %48 = math.tanh %47 : vector<2x32xf32>
    %cst_28 = arith.constant dense<0.000000e+00> : vector<2x32xf32>
    %49 = tpu.matmul %48, %3, %cst_28 {dimension_numbers = #tpu.dot_dimension_numbers<[1], [0], [0], [1], [0, 0, 1, 1], [], []>} : vector<2x32xf32>, vector<32x32xf32>, vector<2x32xf32> -> vector<2x32xf32>
    %cst_29 = arith.constant dense<0.000000e+00> : vector<2x32xf32>
    %50 = tpu.matmul %43, %4, %cst_29 {dimension_numbers = #tpu.dot_dimension_numbers<[1], [0], [0], [1], [0, 0, 1, 1], [], []>} : vector<2x32xf32>, vector<32x32xf32>, vector<2x32xf32> -> vector<2x32xf32>
    %51 = arith.addf %49, %50 : vector<2x32xf32>
    %52 = arith.addf %51, %20 : vector<2x32xf32>
    %53 = math.tanh %52 : vector<2x32xf32>
    %c4 = arith.constant 4 : index
    %c0_30 = arith.constant 0 : index
    %54 = vector.load %arg6[%c4, %c0_30] : memref<16x32xf32, #tpu.memory_space<vmem>>, vector<2x32xf32>
    tpu.vector_store %arg6[%c4, %c0_30], %53 {strides = array<i32>} : memref<16x32xf32, #tpu.memory_space<vmem>>, vector<2x32xf32>,
    %55 = vector.extract_strided_slice %18 {offsets = [6, 0], sizes = [2, 32], strides = [1, 1]} : vector<16x32xf32> to vector<2x32xf32>
    %cst_31 = arith.constant dense<0.000000e+00> : vector<2x32xf32>
    %56 = tpu.matmul %48, %2, %cst_31 {dimension_numbers = #tpu.dot_dimension_numbers<[1], [0], [0], [1], [0, 0, 1, 1], [], []>} : vector<2x32xf32>, vector<32x32xf32>, vector<2x32xf32> -> vector<2x32xf32>
    %57 = arith.addf %55, %56 : vector<2x32xf32>
    %58 = math.tanh %57 : vector<2x32xf32>
    %cst_32 = arith.constant dense<0.000000e+00> : vector<2x32xf32>
    %59 = tpu.matmul %58, %3, %cst_32 {dimension_numbers = #tpu.dot_dimension_numbers<[1], [0], [0], [1], [0, 0, 1, 1], [], []>} : vector<2x32xf32>, vector<32x32xf32>, vector<2x32xf32> -> vector<2x32xf32>
    %cst_33 = arith.constant dense<0.000000e+00> : vector<2x32xf32>
    %60 = tpu.matmul %53, %4, %cst_33 {dimension_numbers = #tpu.dot_dimension_numbers<[1], [0], [0], [1], [0, 0, 1, 1], [], []>} : vector<2x32xf32>, vector<32x32xf32>, vector<2x32xf32> -> vector<2x32xf32>
    %61 = arith.addf %59, %60 : vector<2x32xf32>
    %62 = arith.addf %61, %20 : vector<2x32xf32>
    %63 = math.tanh %62 : vector<2x32xf32>
    %c6 = arith.constant 6 : index
    %c0_34 = arith.constant 0 : index
    %64 = vector.load %arg6[%c6, %c0_34] : memref<16x32xf32, #tpu.memory_space<vmem>>, vector<2x32xf32>
    tpu.vector_store %arg6[%c6, %c0_34], %63 {strides = array<i32>} : memref<16x32xf32, #tpu.memory_space<vmem>>, vector<2x32xf32>,
    %65 = vector.extract_strided_slice %18 {offsets = [8, 0], sizes = [2, 32], strides = [1, 1]} : vector<16x32xf32> to vector<2x32xf32>
    %cst_35 = arith.constant dense<0.000000e+00> : vector<2x32xf32>
    %66 = tpu.matmul %58, %2, %cst_35 {dimension_numbers = #tpu.dot_dimension_numbers<[1], [0], [0], [1], [0, 0, 1, 1], [], []>} : vector<2x32xf32>, vector<32x32xf32>, vector<2x32xf32> -> vector<2x32xf32>
    %67 = arith.addf %65, %66 : vector<2x32xf32>
    %68 = math.tanh %67 : vector<2x32xf32>
    %cst_36 = arith.constant dense<0.000000e+00> : vector<2x32xf32>
    %69 = tpu.matmul %68, %3, %cst_36 {dimension_numbers = #tpu.dot_dimension_numbers<[1], [0], [0], [1], [0, 0, 1, 1], [], []>} : vector<2x32xf32>, vector<32x32xf32>, vector<2x32xf32> -> vector<2x32xf32>
    %cst_37 = arith.constant dense<0.000000e+00> : vector<2x32xf32>
    %70 = tpu.matmul %63, %4, %cst_37 {dimension_numbers = #tpu.dot_dimension_numbers<[1], [0], [0], [1], [0, 0, 1, 1], [], []>} : vector<2x32xf32>, vector<32x32xf32>, vector<2x32xf32> -> vector<2x32xf32>
    %71 = arith.addf %69, %70 : vector<2x32xf32>
    %72 = arith.addf %71, %20 : vector<2x32xf32>
    %73 = math.tanh %72 : vector<2x32xf32>
    %c8 = arith.constant 8 : index
    %c0_38 = arith.constant 0 : index
    %74 = vector.load %arg6[%c8, %c0_38] : memref<16x32xf32, #tpu.memory_space<vmem>>, vector<2x32xf32>
    tpu.vector_store %arg6[%c8, %c0_38], %73 {strides = array<i32>} : memref<16x32xf32, #tpu.memory_space<vmem>>, vector<2x32xf32>,
    %75 = vector.extract_strided_slice %18 {offsets = [10, 0], sizes = [2, 32], strides = [1, 1]} : vector<16x32xf32> to vector<2x32xf32>
    %cst_39 = arith.constant dense<0.000000e+00> : vector<2x32xf32>
    %76 = tpu.matmul %68, %2, %cst_39 {dimension_numbers = #tpu.dot_dimension_numbers<[1], [0], [0], [1], [0, 0, 1, 1], [], []>} : vector<2x32xf32>, vector<32x32xf32>, vector<2x32xf32> -> vector<2x32xf32>
    %77 = arith.addf %75, %76 : vector<2x32xf32>
    %78 = math.tanh %77 : vector<2x32xf32>
    %cst_40 = arith.constant dense<0.000000e+00> : vector<2x32xf32>
    %79 = tpu.matmul %78, %3, %cst_40 {dimension_numbers = #tpu.dot_dimension_numbers<[1], [0], [0], [1], [0, 0, 1, 1], [], []>} : vector<2x32xf32>, vector<32x32xf32>, vector<2x32xf32> -> vector<2x32xf32>
    %cst_41 = arith.constant dense<0.000000e+00> : vector<2x32xf32>
    %80 = tpu.matmul %73, %4, %cst_41 {dimension_numbers = #tpu.dot_dimension_numbers<[1], [0], [0], [1], [0, 0, 1, 1], [], []>} : vector<2x32xf32>, vector<32x32xf32>, vector<2x32xf32> -> vector<2x32xf32>
    %81 = arith.addf %79, %80 : vector<2x32xf32>
    %82 = arith.addf %81, %20 : vector<2x32xf32>
    %83 = math.tanh %82 : vector<2x32xf32>
    %c10 = arith.constant 10 : index
    %c0_42 = arith.constant 0 : index
    %84 = vector.load %arg6[%c10, %c0_42] : memref<16x32xf32, #tpu.memory_space<vmem>>, vector<2x32xf32>
    tpu.vector_store %arg6[%c10, %c0_42], %83 {strides = array<i32>} : memref<16x32xf32, #tpu.memory_space<vmem>>, vector<2x32xf32>,
    %85 = vector.extract_strided_slice %18 {offsets = [12, 0], sizes = [2, 32], strides = [1, 1]} : vector<16x32xf32> to vector<2x32xf32>
    %cst_43 = arith.constant dense<0.000000e+00> : vector<2x32xf32>
    %86 = tpu.matmul %78, %2, %cst_43 {dimension_numbers = #tpu.dot_dimension_numbers<[1], [0], [0], [1], [0, 0, 1, 1], [], []>} : vector<2x32xf32>, vector<32x32xf32>, vector<2x32xf32> -> vector<2x32xf32>
    %87 = arith.addf %85, %86 : vector<2x32xf32>
    %88 = math.tanh %87 : vector<2x32xf32>
    %cst_44 = arith.constant dense<0.000000e+00> : vector<2x32xf32>
    %89 = tpu.matmul %88, %3, %cst_44 {dimension_numbers = #tpu.dot_dimension_numbers<[1], [0], [0], [1], [0, 0, 1, 1], [], []>} : vector<2x32xf32>, vector<32x32xf32>, vector<2x32xf32> -> vector<2x32xf32>
    %cst_45 = arith.constant dense<0.000000e+00> : vector<2x32xf32>
    %90 = tpu.matmul %83, %4, %cst_45 {dimension_numbers = #tpu.dot_dimension_numbers<[1], [0], [0], [1], [0, 0, 1, 1], [], []>} : vector<2x32xf32>, vector<32x32xf32>, vector<2x32xf32> -> vector<2x32xf32>
    %91 = arith.addf %89, %90 : vector<2x32xf32>
    %92 = arith.addf %91, %20 : vector<2x32xf32>
    %93 = math.tanh %92 : vector<2x32xf32>
    %c12 = arith.constant 12 : index
    %c0_46 = arith.constant 0 : index
    %94 = vector.load %arg6[%c12, %c0_46] : memref<16x32xf32, #tpu.memory_space<vmem>>, vector<2x32xf32>
    tpu.vector_store %arg6[%c12, %c0_46], %93 {strides = array<i32>} : memref<16x32xf32, #tpu.memory_space<vmem>>, vector<2x32xf32>,
    %95 = vector.extract_strided_slice %18 {offsets = [14, 0], sizes = [2, 32], strides = [1, 1]} : vector<16x32xf32> to vector<2x32xf32>
    %cst_47 = arith.constant dense<0.000000e+00> : vector<2x32xf32>
    %96 = tpu.matmul %88, %2, %cst_47 {dimension_numbers = #tpu.dot_dimension_numbers<[1], [0], [0], [1], [0, 0, 1, 1], [], []>} : vector<2x32xf32>, vector<32x32xf32>, vector<2x32xf32> -> vector<2x32xf32>
    %97 = arith.addf %95, %96 : vector<2x32xf32>
    %98 = math.tanh %97 : vector<2x32xf32>
    %cst_48 = arith.constant dense<0.000000e+00> : vector<2x32xf32>
    %99 = tpu.matmul %98, %3, %cst_48 {dimension_numbers = #tpu.dot_dimension_numbers<[1], [0], [0], [1], [0, 0, 1, 1], [], []>} : vector<2x32xf32>, vector<32x32xf32>, vector<2x32xf32> -> vector<2x32xf32>
    %cst_49 = arith.constant dense<0.000000e+00> : vector<2x32xf32>
    %100 = tpu.matmul %93, %4, %cst_49 {dimension_numbers = #tpu.dot_dimension_numbers<[1], [0], [0], [1], [0, 0, 1, 1], [], []>} : vector<2x32xf32>, vector<32x32xf32>, vector<2x32xf32> -> vector<2x32xf32>
    %101 = arith.addf %99, %100 : vector<2x32xf32>
    %102 = arith.addf %101, %20 : vector<2x32xf32>
    %103 = math.tanh %102 : vector<2x32xf32>
    %c14 = arith.constant 14 : index
    %c0_50 = arith.constant 0 : index
    %104 = vector.load %arg6[%c14, %c0_50] : memref<16x32xf32, #tpu.memory_space<vmem>>, vector<2x32xf32>
    tpu.vector_store %arg6[%c14, %c0_50], %103 {strides = array<i32>} : memref<16x32xf32, #tpu.memory_space<vmem>>, vector<2x32xf32>,
    %c0_51 = arith.constant 0 : index
    %c0_52 = arith.constant 0 : index
    %105 = vector.load %arg6[%c0_51, %c0_52] : memref<16x32xf32, #tpu.memory_space<vmem>>, vector<16x32xf32>
    %cst_53 = arith.constant dense<0.000000e+00> : vector<16x128xf32>
    %106 = tpu.matmul %105, %7, %cst_53 {dimension_numbers = #tpu.dot_dimension_numbers<[1], [0], [0], [1], [0, 0, 1, 1], [], []>} : vector<16x32xf32>, vector<32x128xf32>, vector<16x128xf32> -> vector<16x128xf32>
    %107 = vector.broadcast %8 : vector<1x128xf32> to vector<16x128xf32>
    %108 = arith.addf %106, %107 : vector<16x128xf32>
    %c0_54 = arith.constant 0 : index
    %c0_55 = arith.constant 0 : index
    %109 = vector.load %arg4[%c0_54, %c0_55] : memref<16x128xf32, #tpu.memory_space<vmem>>, vector<16x128xf32>
    tpu.vector_store %arg4[%c0_54, %c0_55], %108 {strides = array<i32>} : memref<16x128xf32, #tpu.memory_space<vmem>>, vector<16x128xf32>,
    %c0_56 = arith.constant 0 : index
    %c0_57 = arith.constant 0 : index
    %c0_58 = arith.constant 0 : index
    %110 = vector.load %arg5[%c0_56, %c0_57, %c0_58] : memref<2x2x32xf32, #tpu.memory_space<vmem>>, vector<1x2x32xf32>
    %111 = vector.shape_cast %110 : vector<1x2x32xf32> to vector<2x32xf32>
    %112 = vector.shape_cast %98 : vector<2x32xf32> to vector<1x2x32xf32>
    tpu.vector_store %arg5[%c0_56, %c0_57, %c0_58], %112 {strides = array<i32>} : memref<2x2x32xf32, #tpu.memory_space<vmem>>, vector<1x2x32xf32>,
    %c1_59 = arith.constant 1 : index
    %c0_60 = arith.constant 0 : index
    %c0_61 = arith.constant 0 : index
    %113 = vector.load %arg5[%c1_59, %c0_60, %c0_61] : memref<2x2x32xf32, #tpu.memory_space<vmem>>, vector<1x2x32xf32>
    %114 = vector.shape_cast %113 : vector<1x2x32xf32> to vector<2x32xf32>
    %115 = vector.shape_cast %103 : vector<2x32xf32> to vector<1x2x32xf32>
    tpu.vector_store %arg5[%c1_59, %c0_60, %c0_61], %115 {strides = array<i32>} : memref<2x2x32xf32, #tpu.memory_space<vmem>>, vector<1x2x32xf32>,
    return
  }
}

</mosaic_0001>

<bundles_post_ra>
// kernel: rnn_language_model_forward.1
= control target key start
LH: loop header
LB: loop body
LE: loop exit
PB: predicated region body
PF: predicated region fallthrough
CT: control target
= control target key end

     0   :  { %v846_v0 = vmov 0   ;;  %vm98_vm0 = vcmask 261120   ;;  %v60_v27 = vlaneseq  ;;  %v847_v30 = vmov 1.0   ;;  %s1202_s0 = inlined_call_operand.vmem [shape: s32[16,1], index: 0, kind: input, shape index: {}]   ;;  %s1203_s2 = inlined_call_operand.vmem [shape: f32[272,32], index: 2, kind: input, shape index: {}]   ;;  %s1204_s1 = inlined_call_operand.vmem [shape: f32[2,2,32], index: 1, kind: input, shape index: {}, may-alias: {1,5}]   ;;  %s1205_s3 = inlined_call_operand.vmem [shape: f32[40,128], index: 3, kind: input, shape index: {}]   ;;  %s1206_s5 = inlined_call_operand.vmem [shape: f32[2,2,32], index: 5, kind: output, shape index: {1}, may-alias: {1,5}]   ;;  %s1207_s4 = inlined_call_operand.vmem [shape: f32[16,128], index: 4, kind: output, shape index: {0}]  }
   0x1   :  { %810 = vset.pattern.permute.xlu0 %v846_v0  ;;  %v58_v1 = vld [vmem:[%s1202_s0] sm:$0xff]  ;;  %v34_v2 = vld [vmem:[%s1203_s2 + $0x78] sm:$0xff]  ;;  %v33_v3 = vld [vmem:[%s1203_s2 + $0x70] sm:$0xff]  ;;  %vm205_vm3 = vcmask 254976   ;;  %vm762_vm4 = vcmask 261126  }
   0x2   :  { %63 = vperm.xlu0 %810, %v58_v1   ;;  %74 = vmatpush.msra.mxu0 %v34_v2  ;;  %v32_v4 = vld [vmem:[%s1203_s2 + $0x68] sm:$0xff]  ;;  %v31_v5 = vld [vmem:[%s1203_s2 + $0x60] sm:$0xff]  ;;  %v30_v7 = vld [vmem:[%s1203_s2 + $0x58] sm:$0xff]  ;;  %v61_v28 = vand.u32 127, %v60_v27 }
   0x3   :  { %v59_v6 = vld [vmem:[%s1202_s0 + $0x8] sm:$0xff]  ;;  %v29_v8 = vld [vmem:[%s1203_s2 + $0x50] sm:$0xff]  ;;  %v27_v10 = vld [vmem:[%s1203_s2 + $0x40] sm:$0xff] }
   0x4   :  { %75 = vmatpush.msra.mxu0 %v33_v3  ;;  %v28_v9 = vld [vmem:[%s1203_s2 + $0x48] sm:$0xff]  ;;  %v26_v11 = vld [vmem:[%s1203_s2 + $0x38] sm:$0xff]  ;;  %v25_v12 = vld [vmem:[%s1203_s2 + $0x30] sm:$0xff] }
   0x5   :  { %v24_v13 = vld [vmem:[%s1203_s2 + $0x28] sm:$0xff]  ;;  %v23_v14 = vld [vmem:[%s1203_s2 + $0x20] sm:$0xff]  ;;  %v22_v15 = vld [vmem:[%s1203_s2 + $0x18] sm:$0xff] }
   0x6   :  { %76 = vmatpush.msra.mxu0 %v32_v4  ;;  %v21_v16 = vld [vmem:[%s1203_s2 + $0x10] sm:$0xff]  ;;  %v20_v17 = vld [vmem:[%s1203_s2 + $0x8] sm:$0xff]  ;;  %v19_v18 = vld [vmem:[%s1203_s2] sm:$0xff] }
   0x7   :  { %v935_v19 = vld [vmem:[%s1203_s2 + $0xb8] sm:$0xff]  ;;  %v940_v20 = vld [vmem:[%s1203_s2 + $0xb0] sm:$0xff]  ;;  %v952_v23 = vld [vmem:[%s1203_s2 + $0xa8] sm:$0xff] }
   0x8   :  { %77 = vmatpush.msra.mxu0 %v31_v5  ;;  %v38_v21 = vld [vmem:[%s1203_s2 + $0x98] sm:$0xff]  ;;  %147 = vmatpush.msra.mxu2 %v935_v19  ;;  %v37_v22 = vld [vmem:[%s1203_s2 + $0x90] sm:$0xff]  ;;  %v36_v24 = vld [vmem:[%s1203_s2 + $0x88] sm:$0xff] }
   0x9   :  { %117 = vmatpush.msra.mxu1 %v38_v21  ;;  %v961_v25 = vld [vmem:[%s1203_s2 + $0xa0] sm:$0xff]  ;;  %v975_v33 = vld [vmem:[%s1203_s2 + $0xf8] sm:$0xff]  ;;  %v980_v34 = vld [vmem:[%s1203_s2 + $0xf0] sm:$0xff] }
   0xa   :  { %66 = vperm.xlu0 %810, %v59_v6   ;;  %78 = vmatpush.msra.mxu0 %v30_v7  ;;  %v129_v26 = vld [vmem:[%s1204_s1] sm:$0x3]  ;;  %v993_v37 = vld [vmem:[%s1203_s2 + $0xe8] sm:$0xff]  ;;  %v780_v39 = vld [vmem:[%s1204_s1 + $0x2] sm:$0x3] }
   0xb   :  { %148 = vmatpush.msra.mxu2 %v940_v20  ;;  %118 = vmatpush.msra.mxu1 %v37_v22  ;;  %v35_v32 = vld [vmem:[%s1203_s2 + $0x80] sm:$0xff]  ;;  %v1012_v40 = vld [vmem:[%s1203_s2 + $0xd8] sm:$0xff]  ;;  %v1020_v41 = vld [vmem:[%s1203_s2 + $0xd0] sm:$0xff] }
   0xc   :  { %79 = vmatpush.msra.mxu0 %v29_v8  ;;  %172 = vmatpush.msra.mxu3 %v975_v33  ;;  %v1000_v38 = vld [vmem:[%s1203_s2 + $0xe0] sm:$0xff]  ;;  %v1029_v42 = vld [vmem:[%s1203_s2 + $0xc8] sm:$0xff] }
   0xd   :  { %149 = vmatpush.msra.mxu2 %v952_v23  ;;  %119 = vmatpush.msra.mxu1 %v36_v24  ;;  %v1038_v43 = vld [vmem:[%s1203_s2 + $0xc0] sm:$0xff]  ;;  %v1076_v51 = vld [vmem:[%s1203_s2 + $0x108] ss:$0 sm:$0xff] }
   0xe   :  { %80 = vmatpush.msra.mxu0 %v28_v9  ;;  %173 = vmatpush.msra.mxu3 %v980_v34  ;;  %v1057_v44 = vld [vmem:[%s1203_s2 + $0x100] ss:$0 sm:$0xff] }
   0xf   :  { %150 = vmatpush.msra.mxu2 %v961_v25  ;;  %120 = vmatpush.msra.mxu1 %v35_v32 }
  0x10   :  { %81 = vmatpush.msra.mxu0 %v27_v10  ;;  %781 = vmatmul.msk.f32.vlgmr.msra.gmra.mxu2 %vm98_vm0, %v129_v26 }
  0x11   :  { %247 = vmatpush.msrb.mxu1 %v975_v33  ;;  %174 = vmatpush.msra.mxu3 %v993_v37 }
  0x12   :  { %82 = vmatpush.msra.mxu0 %v26_v11  ;;  %195 = vmatpush.msrb.mxu2 %v1012_v40 }
  0x13   :  { %248 = vmatpush.msrb.mxu1 %v980_v34  ;;  %175 = vmatpush.msra.mxu3 %v1000_v38 }
  0x14   :  { %83 = vmatpush.msra.mxu0 %v25_v12  ;;  %782 = vmatmul.msk.f32.vlgmr.msra.gmra.mxu3 %vm98_vm0, %v780_v39  ;;  %v54_v39 = vld [vmem:[%s1205_s3 + $0x8] sm:$0xff] }
  0x15   :  { %249 = vmatpush.msrb.mxu1 %v993_v37  ;;  %219 = vmatpush.msrb.mxu3 %v935_v19 }
  0x16   :  { %84 = vmatpush.msra.mxu0 %v24_v13  ;;  %196 = vmatpush.msrb.mxu2 %v1020_v41 }
  0x17   :  { %250 = vmatpush.msrb.mxu1 %v1000_v38  ;;  %220 = vmatpush.msrb.mxu3 %v940_v20 }
  0x18   :  { %85 = vmatpush.msra.mxu0 %v23_v14  ;;  %197 = vmatpush.msrb.mxu2 %v1029_v42 }
  0x19   :  { %221 = vmatpush.msrb.mxu3 %v952_v23 }
  0x1a   :  { %86 = vmatpush.msra.mxu0 %v22_v15  ;;  %198 = vmatpush.msrb.mxu2 %v1038_v43 }
  0x1b   :  { %222 = vmatpush.msrb.mxu3 %v961_v25 }
  0x1c   :  { %87 = vmatpush.msra.mxu0 %v21_v16  ;;  %271 = vmatpush.msra.mxu2 %v1012_v40 }
  0x1d   :  { %294 = vmatpush.msra.mxu3 %v935_v19 }
  0x1e   :  { %88 = vmatpush.msra.mxu0 %v20_v17  ;;  %272 = vmatpush.msra.mxu2 %v1020_v41 }
  0x1f   :  { %295 = vmatpush.msra.mxu3 %v940_v20 }
  0x20   :  { %89 = vmatpush.msra.mxu0 %v19_v18  ;;  %273 = vmatpush.msra.mxu2 %v1029_v42 }
  0x21   :  { %296 = vmatpush.msra.mxu3 %v952_v23 }
  0x22   :  { %469 = vmatpush.msrb.mxu0 %v975_v33  ;;  %274 = vmatpush.msra.mxu2 %v1038_v43 }
  0x23   :  { %297 = vmatpush.msra.mxu3 %v961_v25 }
  0x24   :  { %470 = vmatpush.msrb.mxu0 %v980_v34 }
  0x26   :  { %471 = vmatpush.msrb.mxu0 %v993_v37 }
  0x28   :  { %472 = vmatpush.msrb.mxu0 %v1000_v38 }
  0x74   :  { %v64_v29 = vpop.permute.xlu0 %63 }
  0x75   :  { %vm68_vm1 = vcmp.eq.s32.totalorder %v64_v29, %v61_v28 }
  0x76   :  { %776 = vmatmul.msk.f32.vlgmr.msra.gmra.mxu0 %vm68_vm1, %v847_v30 }
  0x77   :  { %567 = vmatpush.msra.mxu0 %v1012_v40 }
  0x79   :  { %568 = vmatpush.msra.mxu0 %v1020_v41 }
  0x7b   :  { %569 = vmatpush.msra.mxu0 %v1029_v42 }
  0x7c   :  { %v67_v31 = vpop.permute.xlu0 %66 }
  0x7d   :  { %vm69_vm2 = vcmp.eq.s32.totalorder %v67_v31, %v61_v28  ;;  %570 = vmatpush.msra.mxu0 %v1038_v43 }
  0x7e   :  { %777 = vmatmul.msk.f32.gmra.mxu0 %vm69_vm2, %v847_v30 }
  0x93   :  { %v152_v46 = vpop.f32.mrf.mxu2 }
  0x97   :  { %v177_v50 = vpop.f32.mrf.mxu3 }
  0xf3   :  { %v91_v35 = vpop.f32.mrf.mxu0 }
  0xf4   :  { %778 = vmatmul.msk.f32.vlgmr.msra.gmra.mxu1 %vm98_vm0, %v91_v35 }
  0xf5   :  { %322 = vmatpush.msra.mxu1 %v975_v33 }
  0xf7   :  { %323 = vmatpush.msra.mxu1 %v980_v34 }
  0xf9   :  { %324 = vmatpush.msra.mxu1 %v993_v37 }
  0xfb   :  { %v94_v36 = vpop.f32.mrf.mxu0  ;;  %325 = vmatpush.msra.mxu1 %v1000_v38 }
  0xfc   :  { %779 = vmatmul.msk.f32.gmra.mxu1 %vm98_vm0, %v94_v36 }
 0x171   :  { %v122_v45 = vpop.f32.mrf.mxu1 }
 0x172   :  { %v1060_v47 = vadd.f32 %v1057_v44, %v122_v45 }
 0x174   :  { %v155_v48 = vadd.f32 %v152_v46, %v1060_v47 }
 0x176   :  { %814 = vtanh.f32 %v155_v48 }
 0x179   :  { %v125_v61 = vpop.f32.mrf.mxu1 }
 0x17a   :  { %v1133_v18 = vadd.f32 %v1057_v44, %v125_v61  ;;  %v813_v61 = vld [vmem:[%s1205_s3 + $0x20] ss:$0 sm:$0xff] }
 0x17c   :  { %v815_v49 = vpop.eup %814 }
 0x17d   :  { %783 = vmatmul.msk.f32.vlgmr.msrb.gmra.mxu2 %vm98_vm0, %v815_v49  ;;  %784 = vmatmul.msk.f32.vlgmr.msrb.gmra.mxu3 %vm98_vm0, %v815_v49 }
 0x17e   :  { %369 = vmatpush.msrb.mxu3 %v935_v19  ;;  %346 = vmatpush.msrb.mxu2 %v1012_v40 }
 0x180   :  { %370 = vmatpush.msrb.mxu3 %v940_v20  ;;  %347 = vmatpush.msrb.mxu2 %v1020_v41 }
 0x182   :  { %371 = vmatpush.msrb.mxu3 %v952_v23  ;;  %348 = vmatpush.msrb.mxu2 %v1029_v42 }
 0x184   :  { %372 = vmatpush.msrb.mxu3 %v961_v25  ;;  %349 = vmatpush.msrb.mxu2 %v1038_v43 }
 0x200   :  { %v200_v52 = vpop.f32.mrf.mxu2  ;;  %v224_v53 = vpop.f32.mrf.mxu3 }
 0x201   :  { %v201_v54 = vadd.f32 %v200_v52, %v177_v50  ;;  %v228_v55 = vrot.slane %v224_v53, 6 }
 0x203   :  { %v203_v56 = vadd.f32 %v1076_v51, %v201_v54  ;;  %v230_v57 = vadd.f32 %v228_v55, %v1060_v47 }
 0x205   :  { %816 = vtanh.f32 %v203_v56 }
 0x206   :  { %818 = vtanh.f32 %v230_v57 }
 0x20b   :  { %v817_v58 = vpop.eup %816 }
 0x20c   :  { %v819_v59 = vpop.eup %818  ;;  %206 = vst.msk [vmem:[#allocation2] sm:$0x3] %vm205_vm3, %v817_v58  ;;  %785 = vmatmul.msk.f32.vlgmr.msrb.gmra.mxu1 %vm98_vm0, %v817_v58 }
 0x20d   :  { %v256_v60 = vrot.slane %v819_v59, 2  ;;  %397 = vmatpush.msrb.mxu1 %v975_v33 }
 0x20f   :  { %786 = vmatmul.msk.f32.vlgmr.msra.gmra.mxu2 %vm98_vm0, %v256_v60  ;;  %787 = vmatmul.msk.f32.vlgmr.msra.gmra.mxu3 %vm98_vm0, %v256_v60 }
 0x210   :  { %444 = vmatpush.msra.mxu3 %v935_v19  ;;  %398 = vmatpush.msrb.mxu1 %v980_v34 }
 0x211   :  { %421 = vmatpush.msra.mxu2 %v1012_v40 }
 0x212   :  { %445 = vmatpush.msra.mxu3 %v940_v20  ;;  %399 = vmatpush.msrb.mxu1 %v993_v37 }
 0x213   :  { %422 = vmatpush.msra.mxu2 %v1020_v41 }
 0x214   :  { %446 = vmatpush.msra.mxu3 %v952_v23  ;;  %400 = vmatpush.msrb.mxu1 %v1000_v38 }
 0x215   :  { %423 = vmatpush.msra.mxu2 %v1029_v42 }
 0x216   :  { %447 = vmatpush.msra.mxu3 %v961_v25 }
 0x217   :  { %424 = vmatpush.msra.mxu2 %v1038_v43 }
 0x289   :  { %v252_v62 = vpop.f32.mrf.mxu1 }
 0x292   :  { %v276_v63 = vpop.f32.mrf.mxu2  ;;  %v299_v0 = vpop.f32.mrf.mxu3 }
 0x293   :  { %v277_v1 = vadd.f32 %v276_v63, %v252_v62  ;;  %v303_v2 = vrot.slane %v299_v0, 4 }
 0x295   :  { %v279_v3 = vadd.f32 %v1076_v51, %v277_v1  ;;  %v305_v4 = vadd.f32 %v303_v2, %v1060_v47 }
 0x297   :  { %820 = vtanh.f32 %v279_v3 }
 0x298   :  { %822 = vtanh.f32 %v305_v4 }
 0x29d   :  { %v821_v5 = vpop.eup %820 }
 0x29e   :  { %v823_v6 = vpop.eup %822  ;;  %281 = vst.msk [vmem:[#allocation2 + $0x2] sm:$0x3] %vm205_vm3, %v821_v5  ;;  %788 = vmatmul.msk.f32.vlgmr.msra.gmra.mxu1 %vm98_vm0, %v821_v5 }
 0x29f   :  { %v331_v7 = vrot.slane %v823_v6, 4  ;;  %492 = vmatpush.msra.mxu1 %v1012_v40 }
 0x2a1   :  { %789 = vmatmul.msk.f32.vlgmr.msrb.gmra.mxu2 %vm98_vm0, %v331_v7  ;;  %790 = vmatmul.msk.f32.vlgmr.msrb.gmra.mxu3 %vm98_vm0, %v331_v7 }
 0x2a2   :  { %515 = vmatpush.msrb.mxu2 %v935_v19  ;;  %493 = vmatpush.msra.mxu1 %v1020_v41 }
 0x2a3   :  { %543 = vmatpush.msrb.mxu3 %v975_v33 }
 0x2a4   :  { %516 = vmatpush.msrb.mxu2 %v940_v20  ;;  %494 = vmatpush.msra.mxu1 %v1029_v42 }
 0x2a5   :  { %544 = vmatpush.msrb.mxu3 %v980_v34 }
 0x2a6   :  { %517 = vmatpush.msrb.mxu2 %v952_v23  ;;  %495 = vmatpush.msra.mxu1 %v1038_v43 }
 0x2a7   :  { %545 = vmatpush.msrb.mxu3 %v993_v37 }
 0x2a8   :  { %518 = vmatpush.msrb.mxu2 %v961_v25 }
 0x2a9   :  { %546 = vmatpush.msrb.mxu3 %v1000_v38 }
 0x31b   :  { %v327_v8 = vpop.f32.mrf.mxu1 }
 0x324   :  { %v351_v9 = vpop.f32.mrf.mxu2  ;;  %v374_v10 = vpop.f32.mrf.mxu3 }
 0x325   :  { %v352_v11 = vadd.f32 %v351_v9, %v327_v8  ;;  %v378_v12 = vrot.slane %v374_v10, 2 }
 0x327   :  { %v354_v13 = vadd.f32 %v1076_v51, %v352_v11  ;;  %v380_v14 = vadd.f32 %v378_v12, %v1060_v47 }
 0x329   :  { %824 = vtanh.f32 %v354_v13 }
 0x32a   :  { %826 = vtanh.f32 %v380_v14 }
 0x32f   :  { %v825_v15 = vpop.eup %824 }
 0x330   :  { %v827_v16 = vpop.eup %826  ;;  %356 = vst.msk [vmem:[#allocation2 + $0x4] sm:$0x3] %vm205_vm3, %v825_v15  ;;  %791 = vmatmul.msk.f32.vlgmr.msrb.gmra.mxu1 %vm98_vm0, %v825_v15 }
 0x331   :  { %v406_v17 = vrot.slane %v827_v16, 6  ;;  %590 = vmatpush.msrb.mxu1 %v935_v19 }
 0x333   :  { %792 = vmatmul.msk.f32.vlgmr.msra.gmra.mxu2 %vm98_vm0, %v406_v17  ;;  %793 = vmatmul.msk.f32.vlgmr.msra.gmra.mxu3 %vm98_vm0, %v406_v17 }
 0x334   :  { %591 = vmatpush.msrb.mxu1 %v940_v20  ;;  %618 = vmatpush.msra.mxu2 %v975_v33 }
 0x335   :  { %642 = vmatpush.msra.mxu3 %v1012_v40 }
 0x336   :  { %592 = vmatpush.msrb.mxu1 %v952_v23  ;;  %619 = vmatpush.msra.mxu2 %v980_v34 }
 0x337   :  { %643 = vmatpush.msra.mxu3 %v1020_v41 }
 0x338   :  { %593 = vmatpush.msrb.mxu1 %v961_v25  ;;  %620 = vmatpush.msra.mxu2 %v993_v37 }
 0x339   :  { %644 = vmatpush.msra.mxu3 %v1029_v42 }
 0x33a   :  { %621 = vmatpush.msra.mxu2 %v1000_v38 }
 0x33b   :  { %645 = vmatpush.msra.mxu3 %v1038_v43 }
 0x3ad   :  { %v402_v21 = vpop.f32.mrf.mxu1 }
 0x3b6   :  { %v426_v22 = vpop.f32.mrf.mxu2  ;;  %v449_v24 = vpop.f32.mrf.mxu3 }
 0x3b7   :  { %v427_v26 = vadd.f32 %v426_v22, %v402_v21  ;;  %v452_v27 = vadd.f32 %v449_v24, %v1133_v18 }
 0x3b9   :  { %v429_v28 = vadd.f32 %v1076_v51, %v427_v26  ;;  %828 = vtanh.f32 %v452_v27 }
 0x3bb   :  { %830 = vtanh.f32 %v429_v28 }
 0x3bf   :  { %v829_v29 = vpop.eup %828 }
 0x3c0   :  { %795 = vmatmul.msk.f32.vlgmr.msra.gmra.mxu1 %vm98_vm0, %v829_v29  ;;  %796 = vmatmul.msk.f32.vlgmr.msrb.gmra.mxu2 %vm98_vm0, %v829_v29 }
 0x3c1   :  { %v831_v30 = vpop.eup %830  ;;  %717 = vmatpush.msrb.mxu2 %v1012_v40  ;;  %693 = vmatpush.msra.mxu1 %v975_v33  ;;  %v53_v40 = vld [vmem:[%s1205_s3] sm:$0xff] }
 0x3c2   :  { %431 = vst.msk [vmem:[#allocation2 + $0x6] sm:$0x3] %vm205_vm3, %v831_v30  ;;  %794 = vmatmul.msk.f32.vlgmr.msrb.gmra.mxu0 %vm98_vm0, %v831_v30 }
 0x3c3   :  { %665 = vmatpush.msrb.mxu0 %v935_v19  ;;  %718 = vmatpush.msrb.mxu2 %v1020_v41 }
 0x3c4   :  { %694 = vmatpush.msra.mxu1 %v980_v34 }
 0x3c5   :  { %666 = vmatpush.msrb.mxu0 %v940_v20  ;;  %719 = vmatpush.msrb.mxu2 %v1029_v42 }
 0x3c6   :  { %695 = vmatpush.msra.mxu1 %v993_v37 }
 0x3c7   :  { %667 = vmatpush.msrb.mxu0 %v952_v23  ;;  %720 = vmatpush.msrb.mxu2 %v1038_v43 }
 0x3c8   :  { %696 = vmatpush.msra.mxu1 %v1000_v38  ;;  %v55_v38 = vld [vmem:[%s1205_s3 + $0x10] sm:$0xff] }
 0x3c9   :  { %668 = vmatpush.msrb.mxu0 %v961_v25  ;;  %v56_v25 = vld [vmem:[%s1205_s3 + $0x18] sm:$0xff]  ;;  %v728_v52 = vld [vmem:[#allocation2] sm:$0xff] }
 0x43d   :  { %v497_v31 = vpop.f32.mrf.mxu1 }
 0x43f   :  { %v474_v19 = vpop.f32.mrf.mxu0 }
 0x440   :  { %v498_v32 = vadd.f32 %v497_v31, %v474_v19 }
 0x442   :  { %v500_v33 = vadd.f32 %v1076_v51, %v498_v32 }
 0x443   :  { %v520_v34 = vpop.f32.mrf.mxu2 }
 0x444   :  { %832 = vtanh.f32 %v500_v33  ;;  %v524_v20 = vrot.slane %v520_v34, 6 }
 0x446   :  { %v526_v35 = vadd.f32 %v524_v20, %v1133_v18 }
 0x448   :  { %834 = vtanh.f32 %v526_v35 }
 0x44a   :  { %v833_v36 = vpop.eup %832 }
 0x44b   :  { %502 = vst.msk [vmem:[#allocation2 + $0x8] sm:$0x3] %vm205_vm3, %v833_v36  ;;  %797 = vmatmul.msk.f32.vlgmr.msrb.gmra.mxu3 %vm98_vm0, %v833_v36 }
 0x44c   :  { %749 = vmatpush.msrb.mxu3 %v56_v25 }
 0x44e   :  { %v835_v23 = vpop.eup %834  ;;  %750 = vmatpush.msrb.mxu3 %v55_v38 }
 0x44f   :  { %v552_v37 = vrot.slane %v835_v23, 2 }
 0x450   :  { %751 = vmatpush.msrb.mxu3 %v54_v39 }
 0x451   :  { %798 = vmatmul.msk.f32.vlgmr.msra.gmra.mxu0 %vm98_vm0, %v552_v37  ;;  %799 = vmatmul.msk.f32.vlgmr.msrb.gmra.mxu1 %vm98_vm0, %v552_v37 }
 0x452   :  { %752 = vmatpush.msrb.mxu3 %v53_v40 }
 0x4ce   :  { %v548_v41 = vpop.f32.mrf.mxu3  ;;  %v572_v42 = vpop.f32.mrf.mxu0 }
 0x4cf   :  { %v573_v43 = vadd.f32 %v572_v42, %v548_v41  ;;  %v595_v44 = vpop.f32.mrf.mxu1 }
 0x4d0   :  { %v599_v45 = vrot.slane %v595_v44, 4 }
 0x4d1   :  { %v575_v46 = vadd.f32 %v1076_v51, %v573_v43 }
 0x4d2   :  { %v601_v47 = vadd.f32 %v599_v45, %v1133_v18 }
 0x4d3   :  { %836 = vtanh.f32 %v575_v46 }
 0x4d4   :  { %838 = vtanh.f32 %v601_v47 }
 0x4d9   :  { %v837_v48 = vpop.eup %836 }
 0x4da   :  { %v839_v49 = vpop.eup %838  ;;  %577 = vst.msk [vmem:[#allocation2 + $0xa] sm:$0x3] %vm205_vm3, %v837_v48  ;;  %800 = vmatmul.msk.f32.vlgmr.msra.gmra.mxu2 %vm98_vm0, %v837_v48 }
 0x4db   :  { %v627_v50 = vrot.slane %v839_v49, 4 }
 0x4dd   :  { %801 = vmatmul.msk.f32.vlgmr.msra.gmra.mxu3 %vm98_vm0, %v627_v50  ;;  %802 = vmatmul.msk.f32.vlgmr.msrb.gmra.mxu0 %vm98_vm0, %v627_v50 }
 0x4e5   :  { %805 = vmatmul.msk.f32.vlgmr.msrb.gmra.mxu3 %vm98_vm0, %v728_v52 }
 0x55a   :  { %v670_v53 = vpop.f32.mrf.mxu0 }
 0x55b   :  { %v674_v54 = vrot.slane %v670_v53, 2 }
 0x55d   :  { %v676_v55 = vadd.f32 %v674_v54, %v1133_v18  ;;  %v623_v56 = vpop.f32.mrf.mxu2 }
 0x55f   :  { %840 = vtanh.f32 %v676_v55 }
 0x560   :  { %v647_v57 = vpop.f32.mrf.mxu3 }
 0x561   :  { %v648_v58 = vadd.f32 %v647_v57, %v623_v56 }
 0x563   :  { %v650_v59 = vadd.f32 %v1076_v51, %v648_v58 }
 0x565   :  { %v841_v60 = vpop.eup %840  ;;  %842 = vtanh.f32 %v650_v59 }
 0x566   :  { %v702_v62 = vrot.slane %v841_v60, 6  ;;  %763 = vst.msk [vmem:[%s1206_s5 - $0x6] sm:$0xc0] %vm762_vm4, %v841_v60 }
 0x568   :  { %804 = vmatmul.msk.f32.vlgmr.msrb.gmra.mxu2 %vm98_vm0, %v702_v62  ;;  %v754_v63 = vpop.f32.mrf.mxu3 }
 0x569   :  { %v755_v0 = vadd.f32 %v813_v61, %v754_v63 }
 0x56b   :  { %v843_v1 = vpop.eup %842  ;;  %760 = vst [vmem:[%s1207_s4] sm:$0xff] %v755_v0 }
 0x56c   :  { %652 = vst.msk [vmem:[#allocation2 + $0xc] sm:$0x3] %vm205_vm3, %v843_v1  ;;  %803 = vmatmul.msk.f32.vlgmr.msra.gmra.mxu1 %vm98_vm0, %v843_v1 }
 0x5e9   :  { %v698_v2 = vpop.f32.mrf.mxu1 }
 0x5eb   :  { %v722_v3 = vpop.f32.mrf.mxu2 }
 0x5ec   :  { %v723_v4 = vadd.f32 %v722_v3, %v698_v2 }
 0x5ee   :  { %v725_v5 = vadd.f32 %v1076_v51, %v723_v4 }
 0x5f0   :  { %844 = vtanh.f32 %v725_v5 }
 0x5f6   :  { %v845_v6 = vpop.eup %844 }
 0x5f7   :  { %727 = vst.msk [vmem:[#allocation2 + $0xe] sm:$0x3] %vm205_vm3, %v845_v6 }
 0x5f8   :  { %807 = vst.msk [vmem:[%s1206_s5 + $0x2] sm:$0x3] %vm205_vm3, %v845_v6 }
 0x5fe   :  { %v729_v7 = vld [vmem:[#allocation2 + $0x8] sm:$0xff] }
 0x5ff   :  { %806 = vmatmul.msk.f32.gmra.mxu3 %vm98_vm0, %v729_v7 }
 0x682   :  { %v757_v8 = vpop.f32.mrf.mxu3 }
 0x683   :  { %v758_v9 = vadd.f32 %v813_v61, %v757_v8 }
 0x685   :  { %761 = vst [vmem:[%s1207_s4 + $0x8] sm:$0xff] %v758_v9 }

</bundles_post_ra>
